<compile_context>
chip_gen: v7x
topology: tpu7x:2x2x1
jax: 0.10.0
libtpu: 0.0.40
codegen_flags: <defaults>
</compile_context>

<pallas_src>
import jax
import jax.numpy as jnp
from jax.experimental import pallas as pl
from jax.experimental.pallas import tpu as pltpu

_LANE = 128      # lane width; K-chunk size when K is tiled
_SUBLANE = 8     # sublane alignment for the batch tile


def _gather_dim1_kernel(x_ref, d_ref, o_ref):
    """out[i, j] = x[i, d[i, j]] via one-hot compare + sublane reduce.

    Layout: K chunk in lanes (last dim), C in sublanes, so the one-hot
    intermediate uses dense vregs even when C << 128.
    """
    x = x_ref[...]                                   # (TB, C), x.dtype
    d = d_ref[...]                                   # (TB, TK), int32
    tb, c = x_ref.shape
    tk = d_ref.shape[1]

    c_iota = jax.lax.broadcasted_iota(jnp.int32, (tb, c, tk), 1)
    mask = d[:, None, :] == c_iota                   # (TB, C, TK) one-hot
    vals = jnp.where(mask, x[:, :, None], jnp.zeros((), x_ref.dtype))
    # Exact: at most one nonzero contribution per (i, j), so summing in
    # x.dtype (even bf16) loses nothing.
    o_ref[...] = jnp.sum(vals, axis=1).astype(o_ref.dtype)


def gather_dim1(x, d, *, block_b=None, block_k=None,
                intermediate_budget_bytes=4 * 1024 * 1024):
    """Equivalent of torch.gather(x, 1, d) for 2-D x, d."""
    B, C = x.shape
    Bd, K = d.shape
    assert B == Bd, "batch dims must match"
    d = d.astype(jnp.int32)
    itemsize = jnp.dtype(x.dtype).itemsize

    # K tiling: keep small K unpadded (masked store beats 6-16x more d/out
    # HBM bytes); tile larger K in 128-lane chunks on a trailing grid axis.
    if block_k is None:
        block_k = K if K <= _LANE else _LANE
    k_tiles = pl.cdiv(K, block_k)

    # Batch tile: bound the (TB, round_up(C,8), round_up(TK,128)) one-hot
    # intermediate; multiple of 8; cap 1024; keep >= 2 tiles for megacore
    # sharding when B is large enough. Sized for v7x's smaller VMEM.
    if block_b is None:
        c_sub = _SUBLANE * pl.cdiv(C, _SUBLANE)
        k_lane = _LANE * pl.cdiv(block_k, _LANE)
        tb = intermediate_budget_bytes // max(1, c_sub * k_lane * max(itemsize, 4))
        tb = max(_SUBLANE, (tb // _SUBLANE) * _SUBLANE)
        tb = min(tb, 1024)
        if B >= 4 * _SUBLANE:
            tb = min(tb, _SUBLANE * pl.cdiv(pl.cdiv(B, 2), _SUBLANE))
        block_b = tb
    if block_b >= B:
        block_b = B          # single full-extent batch tile (any B, no padding)
    b_tiles = pl.cdiv(B, block_b)

    if k_tiles == 1:
        grid = (b_tiles,)
        x_spec = pl.BlockSpec((block_b, C), lambda i: (i, 0))
        d_spec = pl.BlockSpec((block_b, block_k), lambda i: (i, 0))
        o_spec = pl.BlockSpec((block_b, block_k), lambda i: (i, 0))
        dims = ("parallel",)
    else:
        # K innermost: x's block index ignores j, so x is not re-DMA'd
        # across K chunks of the same batch tile.
        grid = (b_tiles, k_tiles)
        x_spec = pl.BlockSpec((block_b, C), lambda i, j: (i, 0))
        d_spec = pl.BlockSpec((block_b, block_k), lambda i, j: (i, j))
        o_spec = pl.BlockSpec((block_b, block_k), lambda i, j: (i, j))
        dims = ("parallel", "arbitrary")

    cost = pl.CostEstimate(
        flops=2 * int(B) * int(K) * int(C),          # compares + selects
        transcendentals=0,
        bytes_accessed=int(B * C * itemsize          # x read
                           + B * K * 4               # d read (int32)
                           + B * K * itemsize),      # out write
    )

    return pl.pallas_call(
        _gather_dim1_kernel,
        out_shape=jax.ShapeDtypeStruct((B, K), x.dtype),
        grid=grid,
        in_specs=[x_spec, d_spec],
        out_specs=o_spec,
        compiler_params=pltpu.CompilerParams(
            dimension_semantics=dims,
            vmem_limit_bytes=32 * 1024 * 1024,       # safe on v7x (64 MiB phys)
        ),
        cost_estimate=cost,
    )(x, d)


if __name__ == "__main__":
    key = jax.random.PRNGKey(0)
    kx, kd = jax.random.split(key)

    # Small shapes consistent with the module's forward (x: [B, C], d: [B, K]).
    B, C, K = 2, 16, 8
    x = jax.random.normal(kx, (B, C), dtype=jnp.float32)
    d = jax.random.randint(kd, (B, K), minval=0, maxval=C, dtype=jnp.int32)
    out = jax.block_until_ready(gather_dim1(x, d))
    ref = jnp.take_along_axis(x, d, axis=1)
    assert out.shape == (B, K) and out.dtype == x.dtype
    assert jnp.allclose(out, ref), "mismatch vs reference gather (small case)"

    # Batch tiling with a ragged last batch tile (no wrapper padding).
    k2x, k2d = jax.random.split(jax.random.PRNGKey(1))
    B2, C2, K2 = 264, 24, 20
    x2 = jax.random.normal(k2x, (B2, C2), dtype=jnp.float32)
    d2 = jax.random.randint(k2d, (B2, K2), minval=0, maxval=C2, dtype=jnp.int32)
    out2 = jax.block_until_ready(gather_dim1(x2, d2))
    ref2 = jnp.take_along_axis(x2, d2, axis=1)
    assert out2.shape == (B2, K2) and out2.dtype == x2.dtype
    assert jnp.allclose(out2, ref2), "mismatch vs reference gather (tiled case)"

    # K grid axis (K > 128, ragged last K tile) + bf16 path.
    k3x, k3d = jax.random.split(jax.random.PRNGKey(2))
    B3, C3, K3 = 40, 10, 300
    x3 = jax.random.normal(k3x, (B3, C3), dtype=jnp.float32).astype(jnp.bfloat16)
    d3 = jax.random.randint(k3d, (B3, K3), minval=0, maxval=C3, dtype=jnp.int32)
    out3 = jax.block_until_ready(gather_dim1(x3, d3))
    ref3 = jnp.take_along_axis(x3, d3, axis=1)
    assert out3.shape == (B3, K3) and out3.dtype == x3.dtype
    assert jnp.array_equal(out3, ref3), "mismatch vs reference gather (K-tiled case)"

    print("KERNEL_OK")
</pallas_src>

<mosaic_0001>
module attributes {stable_mosaic.version = 11 : i64} {
  func.func @_gather_dim1_kernel(%arg0: i32, %arg1: memref<2x16xf32, #tpu.memory_space<vmem>>, %arg2: memref<2x8xi32, #tpu.memory_space<vmem>>, %arg3: memref<2x8xf32, #tpu.memory_space<vmem>>) attributes {dimension_semantics = [#tpu.dimension_semantics<parallel>], iteration_bounds = array<i64: 1>, scalar_prefetch = 0 : i64, scratch_operands = 0 : i64, tpu.core_type = #tpu.core_type<tc>, window_params = [{transform_indices = @transform_0, window_bounds = array<i64: 2, 16>}, {transform_indices = @transform_1, window_bounds = array<i64: 2, 8>}, {transform_indices = @transform_2, window_bounds = array<i64: 2, 8>}]} {
    %c0 = arith.constant 0 : index
    %c0_0 = arith.constant 0 : index
    %0 = vector.load %arg1[%c0, %c0_0] : memref<2x16xf32, #tpu.memory_space<vmem>>, vector<2x16xf32>
    %c0_1 = arith.constant 0 : index
    %c0_2 = arith.constant 0 : index
    %1 = vector.load %arg2[%c0_1, %c0_2] : memref<2x8xi32, #tpu.memory_space<vmem>>, vector<2x8xi32>
    %2 = tpu.iota {dimensions = array<i32: 1>} : vector<2x16x8xi32>
    %3 = vector.shape_cast %1 : vector<2x8xi32> to vector<2x1x8xi32>
    %4 = vector.broadcast %3 : vector<2x1x8xi32> to vector<2x16x8xi32>
    %5 = arith.cmpi eq, %4, %2 : vector<2x16x8xi32>
    %6 = vector.shape_cast %0 : vector<2x16xf32> to vector<2x16x1xf32>
    %cst = arith.constant 0.000000e+00 : f32
    %7 = vector.shape_cast %6 : vector<2x16x1xf32> to vector<2x16x1xf32>
    %8 = vector.broadcast %7 : vector<2x16x1xf32> to vector<2x16x8xf32>
    %9 = vector.broadcast %cst : f32 to vector<2x16x8xf32>
    %10 = arith.select %5, %8, %9 : vector<2x16x8xi1>, vector<2x16x8xf32>
    %cst_3 = arith.constant dense<0.000000e+00> : vector<2x8xf32>
    %11 = vector.multi_reduction <add>, %10, %cst_3 [1] : vector<2x16x8xf32> to vector<2x8xf32>
    %c0_4 = arith.constant 0 : index
    %c0_5 = arith.constant 0 : index
    %12 = vector.load %arg3[%c0_4, %c0_5] : memref<2x8xf32, #tpu.memory_space<vmem>>, vector<2x8xf32>
    tpu.vector_store %arg3[%c0_4, %c0_5], %11 {strides = array<i32>} : memref<2x8xf32, #tpu.memory_space<vmem>>, vector<2x8xf32>,
    return
  }
  func.func @transform_0(%arg0: i32) -> (i32, i32) {
    %c0_i32 = arith.constant 0 : i32
    %c0_i32_0 = arith.constant 0 : i32
    return %arg0, %c0_i32 : i32, i32
  }
  func.func @transform_1(%arg0: i32) -> (i32, i32) {
    %c0_i32 = arith.constant 0 : i32
    %c0_i32_0 = arith.constant 0 : i32
    return %arg0, %c0_i32 : i32, i32
  }
  func.func @transform_2(%arg0: i32) -> (i32, i32) {
    %c0_i32 = arith.constant 0 : i32
    %c0_i32_0 = arith.constant 0 : i32
    return %arg0, %c0_i32 : i32, i32
  }
}

</mosaic_0001>

<bundles_post_ra>
// kernel: tpu_custom_call.1
= control target key start
LH: loop header
LB: loop body
LE: loop exit
PB: predicated region body
PF: predicated region fallthrough
CT: control target
= control target key end

     0   :  { %7 = vsyncpa [#allocation3], 0  ;;  %s227_s0 = inlined_call_operand.hbm [shape: f32[2,16], index: 0, kind: input, shape index: {}]   ;;  %s228_s1 = inlined_call_operand.vmem [shape: s32[2,8], index: 1, kind: input, shape index: {}]   ;;  %s229_s2 = inlined_call_operand.hbm [shape: f32[2,8], index: 2, kind: output, shape index: {}]  }
   0x1   :  { %8 = vsyncpa [#allocation4], 0  ;;  %s182_s9 = smov [#allocation2]   ;;  %s134_s13 = scalar_lea.hbm %s227_s0, 32 }
   0x2   :  { %s15_s10 = sshll.u32 %s182_s9, 4  ;;  %p135_p0 = scmp.ne.s32.totalorder %s227_s0, %s134_s13  ;;  %s16_s10 = int_to_ptr.vmem [resolvable:$true] %s15_s10 }
   0x3   :  { %p138_p1 = scmp.lt.u32.totalorder %s134_s13, %s227_s0 }
   0x5   :  { %p140_p2 = pnand %p138_p1, %p135_p0 }
   0x7   :  { %143 = shalt.err (!%p140_p2)
}
   0x8   :  { %s144_s18 = scalar_lea.vmem %s16_s10, 32  ;;  %p149_p4 = scmp.lt.s32.totalorder %s16_s10, %s16_s10 }
   0x9   :  { %p145_p3 = scmp.ne.s32.totalorder %s16_s10, %s144_s18  ;;  %p150_p5 = scmp.lt.s32.totalorder %s144_s18, %s144_s18 }
   0xb   :  { %p151_p6 = por %p150_p5, %p149_p4 }
   0xd   :  { %p152_p7 = pnand %p151_p6, %p145_p3 }
   0xf   :  { %155 = shalt.err (!%p152_p7)
}
  0x10   :  { %18 = dma.hbm_to_vmem [thread:$0]  %s227_s0, 32, %s16_s10, [#allocation3]  }
  0x11   :  { %178 = dma.done.wait [#allocation3], 32  }
  0x12   :  { %179 = vsyncadd [#allocation3], 4294967264  ;;  %v26_v0 = vlaneseq  ;;  %v183_v1 = vmov 1966171168   ;;  %v24_v9 = vld [vmem:[#allocation2] sm:$0x3] }
  0x13   :  { %v38_v2 = vunpack.c.l.s4 %v183_v1  ;;  %v130_v10 = vld.sshfl [vmem:[%s228_s1] sm:$0x11 pattern:$0x75316420]  ;;  %vm89_vm4 = vcmask 64512   ;;  %s184_s0 = smov [#allocation5]  }
  0x14   :  { %v27_v3 = vshrl.u32 %v26_v0, 7  ;;  %v36_v13 = vcombine.high %v130_v10, %v130_v10  ;;  %s121_s1 = sshll.u32 %s184_s0, 4  ;;  %vm110_vm5 = vcmask 1041409   ;;  %vm113_vm6 = vcmask 58368   ;;  %s122_s1 = int_to_ptr.vmem [resolvable:$true] %s121_s1 }
  0x15   :  { %v39_v4 = vunpack.c.0.s8 %v38_v2  ;;  %s156_s23 = scalar_lea.vmem %s122_s1, 32  ;;  %p161_p9 = scmp.lt.s32.totalorder %s122_s1, %s122_s1 }
  0x16   :  { %v76_v5 = vsub.s32 1, %v27_v3  ;;  %v53_v6 = vsub.s32 0, %v27_v3  ;;  %v28_v8 = vadd.s32 8, %v27_v3  ;;  %p157_p8 = scmp.ne.s32.totalorder %s122_s1, %s156_s23  ;;  %p162_p10 = scmp.lt.s32.totalorder %s156_s23, %s156_s23 }
  0x17   :  { %v42_v7 = vsub.s32 %v39_v4, %v27_v3 }
  0x18   :  { %v77_v11 = vrot.slane %v24_v9, %v76_v5  ;;  %v66_v12 = vrot.slane %v24_v9, %v53_v6  ;;  %p163_p11 = por %p162_p10, %p161_p9 }
  0x19   :  { %v43_v14 = vrot.slane %v130_v10, %v42_v7  ;;  %v50_v15 = vrot.slane %v36_v13, %v42_v7 }
  0x1a   :  { %79 = vbcast.lane.b32.xlu1 %v77_v11, 256  ;;  %68 = vbcast.lane.b32.xlu0 %v66_v12, 256  ;;  %p164_p12 = pnand %p163_p11, %p157_p8 }
  0x1b   :  { %v54_v16 = vrot.slane %v43_v14, %v53_v6  ;;  %v58_v17 = vrot.slane %v50_v15, %v53_v6 }
  0x1d   :  { %vm59_vm0 = vcmp.eq.s32.totalorder %v54_v16, %v27_v3  ;;  %vm60_vm1 = vcmp.eq.s32.totalorder %v54_v16, %v28_v8  ;;  %vm61_vm2 = vcmp.eq.s32.totalorder %v58_v17, %v27_v3  ;;  %vm62_vm3 = vcmp.eq.s32.totalorder %v58_v17, %v28_v8 }
  0x1e   :  { %83 = vbcast.lane.b32.xlu1 %v77_v11, 264  ;;  %72 = vbcast.lane.b32.xlu0 %v66_v12, 264 }
  0x8c   :  { %v80_v18 = vpop.permute.xlu1 %79  ;;  %v69_v19 = vpop.permute.xlu0 %68 }
  0x8d   :  { %v87_v20 = vsel %vm61_vm2, %v80_v18, 0.0  ;;  %v85_v21 = vsel %vm59_vm0, %v69_v19, 0.0 }
  0x8e   :  { %v99_v26 = vsel %vm89_vm4, %v87_v20, 0.0  ;;  %v90_v27 = vsel %vm89_vm4, %v85_v21, 0.0 }
  0x90   :  { %v84_v22 = vpop.permute.xlu1 %83  ;;  %v73_v23 = vpop.permute.xlu0 %72 }
  0x91   :  { %v88_v24 = vsel %vm62_vm3, %v84_v22, 0.0  ;;  %v86_v25 = vsel %vm60_vm1, %v73_v23, 0.0 }
  0x92   :  { %v100_v28 = vsel %vm89_vm4, %v88_v24, 0.0  ;;  %v91_v29 = vsel %vm89_vm4, %v86_v25, 0.0 }
  0x93   :  { %v101_v30 = vadd.f32 %v100_v28, %v99_v26  ;;  %v92_v31 = vadd.f32 %v91_v29, %v90_v27 }
  0x95   :  { %v102_v32 = vrot.slane %v101_v30, 4  ;;  %v93_v33 = vrot.slane %v92_v31, 4 }
  0x97   :  { %v103_v34 = vadd.f32 %v102_v32, %v101_v30  ;;  %v94_v35 = vadd.f32 %v93_v33, %v92_v31 }
  0x99   :  { %v104_v36 = vrot.slane %v103_v34, 2  ;;  %v95_v37 = vrot.slane %v94_v35, 2 }
  0x9b   :  { %v105_v38 = vadd.f32 %v104_v36, %v103_v34  ;;  %v96_v39 = vadd.f32 %v95_v37, %v94_v35 }
  0x9d   :  { %v106_v40 = vrot.slane %v105_v38, 1  ;;  %v97_v41 = vrot.slane %v96_v39, 1 }
  0x9f   :  { %v98_v42 = vadd.f32 %v97_v41, %v96_v39  ;;  %v107_v43 = vadd.f32 %v106_v40, %v105_v38 }
  0xa1   :  { %v111_v44 = vsel %vm110_vm5, %v107_v43, %v98_v42 }
  0xa2   :  { %114 = vst.msk [vmem:[#allocation5] sm:$0x3] %vm113_vm6, %v111_v44 }
  0xa3   :  { %167 = shalt.err (!%p164_p12)
}
  0xa4   :  { %s168_s26 = scalar_lea.hbm %s229_s2, 32 }
  0xa5   :  { %p169_p13 = scmp.ne.s32.totalorder %s229_s2, %s168_s26  ;;  %p172_p0 = scmp.lt.u32.totalorder %s168_s26, %s229_s2 }
  0xa7   :  { %p174_p1 = pnand %p172_p0, %p169_p13 }
  0xa9   :  { %177 = shalt.err (!%p174_p1)
}
  0xaa   :  { %124 = dma.vmem_to_hbm [thread:$0]  %s122_s1, 32, %s229_s2, [#allocation4]  }
  0xab   :  { %180 = dma.done.wait [#allocation4], 32  }
  0xac   :  { %181 = vsyncadd [#allocation4], 4294967264 }
  0xad   :  { %128 = vsyncpa [#allocation3], 1 }
  0xae   :  { %129 = vsyncpa [#allocation4], 1 }

</bundles_post_ra>
